<compile_context>
chip_gen: v6e
topology: v6e:2x2x1
jax: 0.10.0
libtpu: 0.0.40
codegen_flags: <defaults>
</compile_context>

<pallas_src>
import functools

import jax
import jax.numpy as jnp
from jax import lax
from jax.experimental import pallas as pl
from jax.experimental.pallas import tpu as pltpu


def _radial_basis_kernel(lengths_ref, centers_ref, out_ref, *, tq):
    """One grid step: build the lane-dense (1, QF) basis row, store tq q_out rows.

    lengths_ref: (1, QF) VMEM, lengths[q_in] * inv_sigma repeated F times
    centers_ref: (1, QF) VMEM, centers[b]   * inv_sigma tiled Q_in*num_P times
    out_ref:     (tq, QF) VMEM output block
    """
    d = lengths_ref[...] - centers_ref[...]            # (1, QF)
    row = jnp.exp(-0.5 * (d * d))                      # Gaussian radial basis (EUP)

    if tq <= 8:
        # Small block: single dense broadcast store.
        out_ref[...] = jnp.broadcast_to(row, (tq, row.shape[1]))
    else:
        # tq is a multiple of 8 (wrapper guarantees): dense 8-row chunk stores.
        chunk = jnp.broadcast_to(row, (8, row.shape[1]))
        n_chunks = tq // 8

        def body(c, carry):
            off = pl.multiple_of(c * 8, 8)
            out_ref[pl.ds(off, 8), :] = chunk
            return carry

        lax.fori_loop(0, n_chunks, body, 0, unroll=(n_chunks <= 8))


def length_qin_radial_kernel_basis(lengths_q_in, centers, inv_sigma, Q_out, num_P):
    """Returns (Q_out, Q_in, num_P, basis_size) float32."""
    Q_in = int(lengths_q_in.shape[0])
    B = int(centers.shape[0])
    F = num_P * B
    QF = Q_in * F                                      # lane-dense flattened trailing dim

    inv_sigma = jnp.asarray(inv_sigma, dtype=jnp.float32)
    # Flat operands so out2d[q_out, q_in*F + p*B + b] = basis(lengths[q_in], centers[b]):
    lengths_flat = jnp.repeat(
        lengths_q_in.astype(jnp.float32) * inv_sigma, F
    ).reshape(1, QF)
    centers_flat = jnp.tile(
        centers.astype(jnp.float32) * inv_sigma, Q_in * num_P
    ).reshape(1, QF)

    # tq from PADDED row bytes; target ~2 MiB blocks (double-buffered ~4 MiB,
    # safe under scoped-VMEM defaults on v5e/v6e/v7x).
    row_padded_bytes = (-(-QF // 128)) * 128 * 4
    target_block_bytes = 2 << 20
    if Q_out <= 8:
        tq = Q_out                                     # full sublane extent (allowed)
    else:
        tq = max(1, target_block_bytes // row_padded_bytes)
        if Q_out >= 16:
            tq = min(tq, -(-Q_out // 2))               # keep >=2 steps for v7x megacore
        tq = min(tq, Q_out)
        tq = max(8, (tq // 8) * 8)                     # multiple of 8 sublanes
    grid_q = pl.cdiv(Q_out, tq)
    # TODO(synk): if a single 8-row padded block ever exceeds ~2 MiB (very large
    # Q_in*num_P*B), add a second grid axis tiling the lane dimension.

    kernel = functools.partial(_radial_basis_kernel, tq=tq)

    grid_spec = pltpu.PrefetchScalarGridSpec(
        num_scalar_prefetch=0,
        grid=(grid_q,),
        in_specs=[
            pl.BlockSpec((1, QF), lambda i: (0, 0)),   # scaled, repeated lengths
            pl.BlockSpec((1, QF), lambda i: (0, 0)),   # scaled, tiled centers
        ],
        out_specs=pl.BlockSpec((tq, QF), lambda i: (i, 0)),
    )

    out2d = pl.pallas_call(
        kernel,
        out_shape=jax.ShapeDtypeStruct((Q_out, QF), jnp.float32),
        grid_spec=grid_spec,
        compiler_params=pltpu.CompilerParams(dimension_semantics=("parallel",)),
    )(lengths_flat, centers_flat)

    # Free metadata reshape back to the module's 4D layout.
    return out2d.reshape(Q_out, Q_in, num_P, B)


def _reference(lengths_q_in, centers, inv_sigma, Q_out, num_P):
    d = (lengths_q_in[:, None] - centers[None, :]) * inv_sigma
    vals = jnp.exp(-0.5 * d * d)                       # (Q_in, B)
    return jnp.broadcast_to(
        vals[None, :, None, :],
        (Q_out, lengths_q_in.shape[0], num_P, centers.shape[0]),
    )


if __name__ == "__main__":
    key = jax.random.PRNGKey(0)

    # Small, module-consistent sizes.
    Q_in = 6                       # Q of the input sampling schema
    P_kernel_size = 3
    num_P = P_kernel_size ** 3     # num_P_diff_vectors = 27
    basis_size = 8                 # radial_basis_size of Q_sampling_schema_in

    # Deterministic "sampling schema": random q-vectors -> lengths_Q_in buffer
    # and max_length (kept as traced arrays, jit-friendly).
    q_vectors = jax.random.normal(key, (Q_in, 3), dtype=jnp.float32)
    lengths_q_in = jnp.linalg.norm(q_vectors, axis=-1)       # (Q_in,)
    max_length = jnp.max(lengths_q_in)

    # Deterministic Gaussian radial basis parameters (see TODO(synk) above).
    centers = jnp.linspace(0.0, max_length, basis_size).astype(jnp.float32)
    sigma = max_length / basis_size
    inv_sigma = 1.0 / sigma

    ok = True
    # Case 1: small Q_out (single grid step, full-block broadcast store).
    Q_out = 4
    out = length_qin_radial_kernel_basis(lengths_q_in, centers, inv_sigma, Q_out, num_P)
    out = jax.block_until_ready(out)
    ref = _reference(lengths_q_in, centers, inv_sigma, Q_out, num_P)
    ok &= out.shape == (Q_out, Q_in, num_P, basis_size)
    ok &= bool(jnp.allclose(out, ref, rtol=1e-5, atol=1e-5))

    # Case 2: larger Q_out (multi-step grid, 8-row chunk stores, partial last block).
    Q_out2 = 20
    out2 = length_qin_radial_kernel_basis(lengths_q_in, centers, inv_sigma, Q_out2, num_P)
    out2 = jax.block_until_ready(out2)
    ref2 = _reference(lengths_q_in, centers, inv_sigma, Q_out2, num_P)
    ok &= out2.shape == (Q_out2, Q_in, num_P, basis_size)
    ok &= bool(jnp.allclose(out2, ref2, rtol=1e-5, atol=1e-5))

    assert ok, "mismatch vs reference"
    print("KERNEL_OK")
</pallas_src>

<mosaic_0001>
module attributes {stable_mosaic.version = 11 : i64} {
  func.func @_radial_basis_kernel(%arg0: i32, %arg1: memref<1x1296xf32, #tpu.memory_space<vmem>>, %arg2: memref<1x1296xf32, #tpu.memory_space<vmem>>, %arg3: memref<4x1296xf32, #tpu.memory_space<vmem>>) attributes {dimension_semantics = [#tpu.dimension_semantics<parallel>], iteration_bounds = array<i64: 1>, scalar_prefetch = 0 : i64, scratch_operands = 0 : i64, tpu.core_type = #tpu.core_type<tc>, window_params = [{pipeline_mode = #tpu.pipeline_mode<synchronous>, transform_indices = @transform_0, window_bounds = array<i64: 1, 1296>}, {pipeline_mode = #tpu.pipeline_mode<synchronous>, transform_indices = @transform_1, window_bounds = array<i64: 1, 1296>}, {transform_indices = @transform_2, window_bounds = array<i64: 4, 1296>}]} {
    %c0 = arith.constant 0 : index
    %c0_0 = arith.constant 0 : index
    %0 = vector.load %arg1[%c0, %c0_0] : memref<1x1296xf32, #tpu.memory_space<vmem>>, vector<1x1296xf32>
    %c0_1 = arith.constant 0 : index
    %c0_2 = arith.constant 0 : index
    %1 = vector.load %arg2[%c0_1, %c0_2] : memref<1x1296xf32, #tpu.memory_space<vmem>>, vector<1x1296xf32>
    %2 = arith.subf %0, %1 : vector<1x1296xf32>
    %3 = arith.mulf %2, %2 : vector<1x1296xf32>
    %cst = arith.constant -5.000000e-01 : f32
    %4 = vector.broadcast %cst : f32 to vector<1x1296xf32>
    %5 = arith.mulf %4, %3 : vector<1x1296xf32>
    %6 = math.exp %5 : vector<1x1296xf32>
    %7 = vector.shape_cast %6 : vector<1x1296xf32> to vector<1x1296xf32>
    %8 = vector.broadcast %7 : vector<1x1296xf32> to vector<4x1296xf32>
    %c0_3 = arith.constant 0 : index
    %c0_4 = arith.constant 0 : index
    %9 = vector.load %arg3[%c0_3, %c0_4] : memref<4x1296xf32, #tpu.memory_space<vmem>>, vector<4x1296xf32>
    tpu.vector_store %arg3[%c0_3, %c0_4], %8 {strides = array<i32>} : memref<4x1296xf32, #tpu.memory_space<vmem>>, vector<4x1296xf32>,
    return
  }
  func.func @transform_0(%arg0: i32) -> (i32, i32) {
    %c0_i32 = arith.constant 0 : i32
    %c0_i32_0 = arith.constant 0 : i32
    %c0_i32_1 = arith.constant 0 : i32
    return %c0_i32, %c0_i32_0 : i32, i32
  }
  func.func @transform_1(%arg0: i32) -> (i32, i32) {
    %c0_i32 = arith.constant 0 : i32
    %c0_i32_0 = arith.constant 0 : i32
    %c0_i32_1 = arith.constant 0 : i32
    return %c0_i32, %c0_i32_0 : i32, i32
  }
  func.func @transform_2(%arg0: i32) -> (i32, i32) {
    %c0_i32 = arith.constant 0 : i32
    %c0_i32_0 = arith.constant 0 : i32
    return %arg0, %c0_i32 : i32, i32
  }
}

</mosaic_0001>

<bundles_post_ra>
// kernel: tpu_custom_call.1
= control target key start
LH: loop header
LB: loop body
LE: loop exit
PB: predicated region body
PF: predicated region fallthrough
CT: control target
= control target key end

     0   :  { %7 = vsyncpa [#allocation3], 0  ;;  %s231_s0 = inlined_call_operand.hbm [shape: f32[1,1296], index: 0, kind: input, shape index: {}]   ;;  %s232_s1 = inlined_call_operand.hbm [shape: f32[1,1296], index: 1, kind: input, shape index: {}]   ;;  %s233_s2 = inlined_call_operand.hbm [shape: f32[4,1296], index: 2, kind: output, shape index: {}]  }
   0x1   :  { %8 = vsyncpa [#allocation6], 0 }
   0x2   :  { %9 = vsyncpa [#allocation4], 0  ;;  %s203_s9 = smov [#allocation2]   ;;  %s204_s11 = smov [#allocation5]  }
   0x3   :  { %s16_s10 = sshll.u32 %s203_s9, 4  ;;  %s26_s12 = sshll.u32 %s204_s11, 4  ;;  %s17_s10 = int_to_ptr.vmem [resolvable:$true] %s16_s10  ;;  %s27_s12 = int_to_ptr.vmem [resolvable:$true] %s26_s12 }
   0x4   :  { %s145_s13 = scalar_lea.vmem %s17_s10, 176  ;;  %s149_s14 = scalar_lea.vmem %s17_s10, 192 }
   0x5   :  { %p146_p0 = scmp.ne.s32.totalorder %s17_s10, %s145_s13  ;;  %p150_p1 = scmp.lt.s32.totalorder %s17_s10, %s17_s10 }
   0x6   :  { %p151_p2 = scmp.lt.s32.totalorder %s149_s14, %s145_s13 }
   0x8   :  { %p152_p3 = por %p151_p2, %p150_p1 }
   0xa   :  { %p153_p4 = pnand %p152_p3, %p146_p0 }
   0xc   :  { %156 = shalt.err (!%p153_p4)
}
   0xd   :  { %19 = dma.hbm_to_vmem [thread:$0]  %s231_s0, 176, %s17_s10, [#allocation3]  }
   0xe   :  { %s165_s17 = scalar_lea.vmem %s27_s12, 176  ;;  %s169_s18 = scalar_lea.vmem %s27_s12, 192 }
   0xf   :  { %p166_p5 = scmp.ne.s32.totalorder %s27_s12, %s165_s17  ;;  %p170_p6 = scmp.lt.s32.totalorder %s27_s12, %s27_s12 }
  0x10   :  { %p171_p7 = scmp.lt.s32.totalorder %s169_s18, %s165_s17 }
  0x12   :  { %p172_p8 = por %p171_p7, %p170_p6 }
  0x14   :  { %p173_p9 = pnand %p172_p8, %p166_p5 }
  0x16   :  { %176 = shalt.err (!%p173_p9)
}
  0x17   :  { %29 = dma.hbm_to_vmem [thread:$0]  %s232_s1, 176, %s27_s12, [#allocation6]  }
  0x18   :  { %197 = dma.done.wait [#allocation3], 176  }
  0x19   :  { %198 = vsyncadd [#allocation3], 4294967120 }
  0x1a   :  { %199 = dma.done.wait [#allocation6], 176  }
  0x1b   :  { %200 = vsyncadd [#allocation6], 4294967120  ;;  %v36_v0 = vld [vmem:[#allocation2] sm:$0xff]  ;;  %v38_v1 = vld [vmem:[#allocation5] sm:$0xff]  ;;  %v52_v12 = vlaneseq  ;;  %vm112_vm0 = vcmask 125952   ;;  %s205_s0 = smov [#allocation7]  }
  0x1c   :  { %v37_v2 = vld [vmem:[#allocation2 + $0x8] sm:$0x7]  ;;  %v40_v3 = vsub.f32 %v36_v0, %v38_v1  ;;  %v39_v4 = vld [vmem:[#allocation5 + $0x8] sm:$0x7]  ;;  %s120_s1 = sshll.u32 %s205_s0, 4  ;;  %s121_s1 = int_to_ptr.vmem [resolvable:$true] %s120_s1 }
  0x1d   :  { %v41_v5 = vsub.f32 %v37_v2, %v39_v4  ;;  %v53_v13 = vshrl.u32 %v52_v12, 7  ;;  %s177_s21 = scalar_lea.vmem %s121_s1, 704  ;;  %p182_p11 = scmp.lt.s32.totalorder %s121_s1, %s121_s1 }
  0x1e   :  { %v42_v6 = vmul.f32 %v40_v3, %v40_v3  ;;  %p178_p10 = scmp.ne.s32.totalorder %s121_s1, %s177_s21  ;;  %p183_p12 = scmp.lt.s32.totalorder %s177_s21, %s177_s21 }
  0x1f   :  { %v43_v7 = vmul.f32 %v41_v5, %v41_v5  ;;  %v54_v14 = vsub.s32 0, %v53_v13  ;;  %v58_v15 = vsub.s32 1, %v53_v13  ;;  %v62_v16 = vsub.s32 2, %v53_v13 }
  0x20   :  { %v44_v8 = vmul.f32 -0.5, %v42_v6  ;;  %v66_v17 = vsub.s32 3, %v53_v13  ;;  %v70_v18 = vsub.s32 4, %v53_v13  ;;  %v74_v19 = vsub.s32 5, %v53_v13  ;;  %p184_p13 = por %p183_p12, %p182_p11 }
  0x21   :  { %v45_v9 = vmul.f32 -0.5, %v43_v7  ;;  %v78_v20 = vsub.s32 6, %v53_v13  ;;  %v82_v21 = vsub.s32 7, %v53_v13 }
  0x22   :  { %v46_v10 = vmul.f32 1.442695, %v44_v8  ;;  %p185_p0 = pnand %p184_p13, %p178_p10 }
  0x23   :  { %v48_v11 = vmul.f32 1.442695, %v45_v9 }
  0x24   :  { %133 = vpow2.f32 %v46_v10 }
  0x25   :  { %135 = vpow2.f32 %v48_v11 }
  0x31   :  { %v134_v22 = vpop.eup %133 }
  0x32   :  { %v136_v23 = vpop.eup %135  ;;  %v55_v24 = vrot.slane %v134_v22, %v54_v14  ;;  %v59_v25 = vrot.slane %v134_v22, %v58_v15  ;;  %v63_v26 = vrot.slane %v134_v22, %v62_v16  ;;  %v67_v27 = vrot.slane %v134_v22, %v66_v17 }
  0x33   :  { %v71_v28 = vrot.slane %v134_v22, %v70_v18  ;;  %v75_v29 = vrot.slane %v134_v22, %v74_v19  ;;  %v79_v30 = vrot.slane %v134_v22, %v78_v20  ;;  %v83_v31 = vrot.slane %v134_v22, %v82_v21 }
  0x34   :  { %v97_v32 = vcombine.low %v55_v24, %v59_v25  ;;  %v98_v33 = vcombine.low %v63_v26, %v67_v27  ;;  %v87_v34 = vrot.slane %v136_v23, %v54_v14  ;;  %v91_v35 = vrot.slane %v136_v23, %v58_v15 }
  0x35   :  { %v99_v36 = vcombine.low %v71_v28, %v75_v29  ;;  %v100_v37 = vcombine.low %v79_v30, %v83_v31  ;;  %v95_v38 = vrot.slane %v136_v23, %v62_v16 }
  0x36   :  { %107 = vst [vmem:[#allocation7] sm:$0xff] %v97_v32  ;;  %108 = vst [vmem:[#allocation7 + $0x8] sm:$0xff] %v98_v33  ;;  %v101_v39 = vcombine.low %v87_v34, %v91_v35 }
  0x37   :  { %109 = vst [vmem:[#allocation7 + $0x10] sm:$0xff] %v99_v36  ;;  %110 = vst [vmem:[#allocation7 + $0x18] sm:$0xff] %v100_v37 }
  0x38   :  { %113 = vst.msk [vmem:[#allocation7 + $0x28] sm:$0xf] %vm112_vm0, %v95_v38  ;;  %111 = vst [vmem:[#allocation7 + $0x20] sm:$0xff] %v101_v39 }
  0x39   :  { %188 = shalt.err (!%p185_p0)
}
  0x3a   :  { %123 = dma.vmem_to_hbm [thread:$0]  %s121_s1, 704, %s233_s2, [#allocation4]  }
  0x3b   :  { %201 = dma.done.wait [#allocation4], 704  }
  0x3c   :  { %202 = vsyncadd [#allocation4], 4294966592 }
  0x3d   :  { %127 = vsyncpa [#allocation3], 1 }
  0x3e   :  { %128 = vsyncpa [#allocation6], 1 }
  0x3f   :  { %129 = vsyncpa [#allocation4], 1 }

</bundles_post_ra>
